<compile_context>
chip_gen: v5e
topology: v5e:2x2
jax: 0.10.0
libtpu: 0.0.40
codegen_flags: <defaults>
</compile_context>

<pallas_src>
import functools

import jax
import jax.numpy as jnp
from jax.experimental import pallas as pl
from jax.experimental.pallas import tpu as pltpu

COLUMN = 6
WINDOW = 30
IN_DIM = COLUMN * WINDOW      # 180
HID = WINDOW                  # 30
MID = COLUMN                  # 6
OUT = 2

HID_PAD = 32                  # 30 -> 32 (sublane-aligned K for layer-2 matmul)
MID_PAD = 8                   # 6  -> 8  (sublane-aligned K for layer-3 matmul)

DEFAULT_TB = 8192             # ~5.9 MiB f32 x-block; double-buffered total ~12 MiB VMEM


def _round_up(n, m):
    return ((n + m - 1) // m) * m


def mlp_kernel(x_ref, w1_ref, b1_ref, w2_ref, b2_ref, w3_ref, b3_ref, o_ref):
    # Whole 3-layer MLP for one batch tile; all operands VMEM-resident.
    x = x_ref[...]                                                        # (TB, 180)
    h1 = jnp.dot(x, w1_ref[...], preferred_element_type=jnp.float32) + b1_ref[...]
    h1 = jnp.maximum(h1, 0.0)                                             # (TB, 32), cols 30:32 are 0
    h2 = jnp.dot(h1, w2_ref[...], preferred_element_type=jnp.float32) + b2_ref[...]
    h2 = jnp.maximum(h2, 0.0)                                             # (TB, 8),  cols 6:8 are 0
    logits = jnp.dot(h2, w3_ref[...], preferred_element_type=jnp.float32) + b3_ref[...]
    o_ref[...] = logits.astype(o_ref.dtype)                               # (TB, 2)


def _pad_params(params):
    """Zero-pad hidden dims (30->32, 6->8). Padding is mathematically inert:
    padded W columns/bias entries are 0 -> padded activations are 0 -> padded
    W rows of the next layer contribute nothing."""
    w1, b1, w2, b2, w3, b3 = params
    w1p = jnp.pad(w1, ((0, 0), (0, HID_PAD - HID)))              # (180, 32)
    b1p = jnp.pad(b1, ((0, 0), (0, HID_PAD - HID)))              # (1, 32)
    w2p = jnp.pad(w2, ((0, HID_PAD - HID), (0, MID_PAD - MID)))  # (32, 8)
    b2p = jnp.pad(b2, ((0, 0), (0, MID_PAD - MID)))              # (1, 8)
    w3p = jnp.pad(w3, ((0, MID_PAD - MID), (0, 0)))              # (8, 2)
    b3p = b3                                                     # (1, 2)
    return w1p, b1p, w2p, b2p, w3p, b3p


@functools.partial(jax.jit, static_argnames=("tb",))
def neural_network_forward(x, params, *, tb=DEFAULT_TB):
    """x: (B, WINDOW, COLUMN) float32. Returns logits (B, 2)."""
    b = x.shape[0]
    x_flat = x.reshape(b, IN_DIM)                 # nn.Flatten (row-major, matches PyTorch)
    w1, b1, w2, b2, w3, b3 = _pad_params(params)

    # Clamp the batch tile so the block never exceeds the (sublane-rounded) batch.
    tb = min(tb, _round_up(b, 8))
    grid = (pl.cdiv(b, tb),)

    weight_bytes = 4 * (w1.size + b1.size + w2.size + b2.size + w3.size + b3.size)
    cost = pl.CostEstimate(
        flops=2 * b * (IN_DIM * HID_PAD + HID_PAD * MID_PAD + MID_PAD * OUT),
        transcendentals=0,
        bytes_accessed=b * IN_DIM * 4 + b * OUT * 4 + weight_bytes,
    )

    full = lambda shape: pl.BlockSpec(shape, lambda i: (0, 0))  # resident weights/biases
    return pl.pallas_call(
        mlp_kernel,
        out_shape=jax.ShapeDtypeStruct((b, OUT), jnp.float32),
        grid=grid,
        in_specs=[
            pl.BlockSpec((tb, IN_DIM), lambda i: (i, 0)),       # x: streamed per batch tile
            full(w1.shape), full(b1.shape),
            full(w2.shape), full(b2.shape),
            full(w3.shape), full(b3.shape),
        ],
        out_specs=pl.BlockSpec((tb, OUT), lambda i: (i, 0)),
        compiler_params=pltpu.CompilerParams(
            dimension_semantics=("parallel",),                   # 2x TCs on v7x; no-op on v5e/v6e
            vmem_limit_bytes=32 << 20,                           # headroom for the 8192-row tile
        ),
        cost_estimate=cost,
    )(x_flat, w1, b1, w2, b2, w3, b3)


def init_params(key):
    """Deterministic PyTorch-style Linear init: U(-1/sqrt(fan_in), 1/sqrt(fan_in)).
    Weights stored transposed vs. PyTorch (in_features, out_features)."""
    def linear(k, fan_in, fan_out):
        kw, kb = jax.random.split(k)
        bound = 1.0 / jnp.sqrt(float(fan_in))
        w = jax.random.uniform(kw, (fan_in, fan_out), jnp.float32, -bound, bound)
        bias = jax.random.uniform(kb, (1, fan_out), jnp.float32, -bound, bound)
        return w, bias

    k1, k2, k3 = jax.random.split(key, 3)
    w1, b1 = linear(k1, IN_DIM, HID)
    w2, b2 = linear(k2, HID, MID)
    w3, b3 = linear(k3, MID, OUT)
    return (w1, b1, w2, b2, w3, b3)


def reference_forward(x, params):
    w1, b1, w2, b2, w3, b3 = params
    h = x.reshape(x.shape[0], IN_DIM)
    h = jnp.maximum(h @ w1 + b1, 0.0)
    h = jnp.maximum(h @ w2 + b2, 0.0)
    return h @ w3 + b3


if __name__ == "__main__":
    key = jax.random.PRNGKey(0)
    kx, kp = jax.random.split(key)

    batch = 8
    x = jax.random.normal(kx, (batch, WINDOW, COLUMN), jnp.float32)
    params = init_params(kp)

    out = neural_network_forward(x, params)
    out = jax.block_until_ready(out)

    ref = reference_forward(x, params)
    assert out.shape == (batch, OUT)
    assert jnp.allclose(out, ref, atol=1e-5, rtol=1e-5)

    # Also exercise a multi-tile, non-divisible batch to check the grid/tail path.
    batch2 = 100
    x2 = jax.random.normal(kx, (batch2, WINDOW, COLUMN), jnp.float32)
    out2 = jax.block_until_ready(neural_network_forward(x2, params, tb=64))
    ref2 = reference_forward(x2, params)
    assert out2.shape == (batch2, OUT)
    assert jnp.allclose(out2, ref2, atol=1e-5, rtol=1e-5)

    print("KERNEL_OK")
</pallas_src>

<mosaic_0001>
module attributes {stable_mosaic.version = 11 : i64} {
  func.func @mlp_kernel(%arg0: i32, %arg1: memref<8x180xf32, #tpu.memory_space<vmem>>, %arg2: memref<180x32xf32, #tpu.memory_space<vmem>>, %arg3: memref<1x32xf32, #tpu.memory_space<vmem>>, %arg4: memref<32x8xf32, #tpu.memory_space<vmem>>, %arg5: memref<1x8xf32, #tpu.memory_space<vmem>>, %arg6: memref<8x2xf32, #tpu.memory_space<vmem>>, %arg7: memref<1x2xf32, #tpu.memory_space<vmem>>, %arg8: memref<8x2xf32, #tpu.memory_space<vmem>>) attributes {dimension_semantics = [#tpu.dimension_semantics<parallel>], iteration_bounds = array<i64: 1>, scalar_prefetch = 0 : i64, scratch_operands = 0 : i64, tpu.core_type = #tpu.core_type<tc>, window_params = [{transform_indices = @transform_0, window_bounds = array<i64: 8, 180>}, {pipeline_mode = #tpu.pipeline_mode<synchronous>, transform_indices = @transform_1, window_bounds = array<i64: 180, 32>}, {pipeline_mode = #tpu.pipeline_mode<synchronous>, transform_indices = @transform_2, window_bounds = array<i64: 1, 32>}, {pipeline_mode = #tpu.pipeline_mode<synchronous>, transform_indices = @transform_3, window_bounds = array<i64: 32, 8>}, {pipeline_mode = #tpu.pipeline_mode<synchronous>, transform_indices = @transform_4, window_bounds = array<i64: 1, 8>}, {pipeline_mode = #tpu.pipeline_mode<synchronous>, transform_indices = @transform_5, window_bounds = array<i64: 8, 2>}, {pipeline_mode = #tpu.pipeline_mode<synchronous>, transform_indices = @transform_6, window_bounds = array<i64: 1, 2>}, {transform_indices = @transform_7, window_bounds = array<i64: 8, 2>}]} {
    %c0 = arith.constant 0 : index
    %c0_0 = arith.constant 0 : index
    %0 = vector.load %arg1[%c0, %c0_0] : memref<8x180xf32, #tpu.memory_space<vmem>>, vector<8x180xf32>
    %c0_1 = arith.constant 0 : index
    %c0_2 = arith.constant 0 : index
    %1 = vector.load %arg2[%c0_1, %c0_2] : memref<180x32xf32, #tpu.memory_space<vmem>>, vector<180x32xf32>
    %cst = arith.constant dense<0.000000e+00> : vector<8x32xf32>
    %2 = tpu.matmul %0, %1, %cst {dimension_numbers = #tpu.dot_dimension_numbers<[1], [0], [0], [1], [0, 0, 1, 1], [], []>} : vector<8x180xf32>, vector<180x32xf32>, vector<8x32xf32> -> vector<8x32xf32>
    %c0_3 = arith.constant 0 : index
    %c0_4 = arith.constant 0 : index
    %3 = vector.load %arg3[%c0_3, %c0_4] : memref<1x32xf32, #tpu.memory_space<vmem>>, vector<1x32xf32>
    %4 = vector.broadcast %3 : vector<1x32xf32> to vector<8x32xf32>
    %5 = arith.addf %2, %4 : vector<8x32xf32>
    %cst_5 = arith.constant 0.000000e+00 : f32
    %6 = vector.broadcast %cst_5 : f32 to vector<8x32xf32>
    %7 = arith.maximumf %5, %6 : vector<8x32xf32>
    %c0_6 = arith.constant 0 : index
    %c0_7 = arith.constant 0 : index
    %8 = vector.load %arg4[%c0_6, %c0_7] : memref<32x8xf32, #tpu.memory_space<vmem>>, vector<32x8xf32>
    %cst_8 = arith.constant dense<0.000000e+00> : vector<8x8xf32>
    %9 = tpu.matmul %7, %8, %cst_8 {dimension_numbers = #tpu.dot_dimension_numbers<[1], [0], [0], [1], [0, 0, 1, 1], [], []>} : vector<8x32xf32>, vector<32x8xf32>, vector<8x8xf32> -> vector<8x8xf32>
    %c0_9 = arith.constant 0 : index
    %c0_10 = arith.constant 0 : index
    %10 = vector.load %arg5[%c0_9, %c0_10] : memref<1x8xf32, #tpu.memory_space<vmem>>, vector<1x8xf32>
    %11 = vector.broadcast %10 : vector<1x8xf32> to vector<8x8xf32>
    %12 = arith.addf %9, %11 : vector<8x8xf32>
    %cst_11 = arith.constant 0.000000e+00 : f32
    %13 = vector.broadcast %cst_11 : f32 to vector<8x8xf32>
    %14 = arith.maximumf %12, %13 : vector<8x8xf32>
    %c0_12 = arith.constant 0 : index
    %c0_13 = arith.constant 0 : index
    %15 = vector.load %arg6[%c0_12, %c0_13] : memref<8x2xf32, #tpu.memory_space<vmem>>, vector<8x2xf32>
    %cst_14 = arith.constant dense<0.000000e+00> : vector<8x2xf32>
    %16 = tpu.matmul %14, %15, %cst_14 {dimension_numbers = #tpu.dot_dimension_numbers<[1], [0], [0], [1], [0, 0, 1, 1], [], []>} : vector<8x8xf32>, vector<8x2xf32>, vector<8x2xf32> -> vector<8x2xf32>
    %c0_15 = arith.constant 0 : index
    %c0_16 = arith.constant 0 : index
    %17 = vector.load %arg7[%c0_15, %c0_16] : memref<1x2xf32, #tpu.memory_space<vmem>>, vector<1x2xf32>
    %18 = vector.broadcast %17 : vector<1x2xf32> to vector<8x2xf32>
    %19 = arith.addf %16, %18 : vector<8x2xf32>
    %c0_17 = arith.constant 0 : index
    %c0_18 = arith.constant 0 : index
    %20 = vector.load %arg8[%c0_17, %c0_18] : memref<8x2xf32, #tpu.memory_space<vmem>>, vector<8x2xf32>
    tpu.vector_store %arg8[%c0_17, %c0_18], %19 {strides = array<i32>} : memref<8x2xf32, #tpu.memory_space<vmem>>, vector<8x2xf32>,
    return
  }
  func.func @transform_0(%arg0: i32) -> (i32, i32) {
    %c0_i32 = arith.constant 0 : i32
    %c0_i32_0 = arith.constant 0 : i32
    return %arg0, %c0_i32 : i32, i32
  }
  func.func @transform_1(%arg0: i32) -> (i32, i32) {
    %c0_i32 = arith.constant 0 : i32
    %c0_i32_0 = arith.constant 0 : i32
    %c0_i32_1 = arith.constant 0 : i32
    return %c0_i32, %c0_i32_0 : i32, i32
  }
  func.func @transform_2(%arg0: i32) -> (i32, i32) {
    %c0_i32 = arith.constant 0 : i32
    %c0_i32_0 = arith.constant 0 : i32
    %c0_i32_1 = arith.constant 0 : i32
    return %c0_i32, %c0_i32_0 : i32, i32
  }
  func.func @transform_3(%arg0: i32) -> (i32, i32) {
    %c0_i32 = arith.constant 0 : i32
    %c0_i32_0 = arith.constant 0 : i32
    %c0_i32_1 = arith.constant 0 : i32
    return %c0_i32, %c0_i32_0 : i32, i32
  }
  func.func @transform_4(%arg0: i32) -> (i32, i32) {
    %c0_i32 = arith.constant 0 : i32
    %c0_i32_0 = arith.constant 0 : i32
    %c0_i32_1 = arith.constant 0 : i32
    return %c0_i32, %c0_i32_0 : i32, i32
  }
  func.func @transform_5(%arg0: i32) -> (i32, i32) {
    %c0_i32 = arith.constant 0 : i32
    %c0_i32_0 = arith.constant 0 : i32
    %c0_i32_1 = arith.constant 0 : i32
    return %c0_i32, %c0_i32_0 : i32, i32
  }
  func.func @transform_6(%arg0: i32) -> (i32, i32) {
    %c0_i32 = arith.constant 0 : i32
    %c0_i32_0 = arith.constant 0 : i32
    %c0_i32_1 = arith.constant 0 : i32
    return %c0_i32, %c0_i32_0 : i32, i32
  }
  func.func @transform_7(%arg0: i32) -> (i32, i32) {
    %c0_i32 = arith.constant 0 : i32
    %c0_i32_0 = arith.constant 0 : i32
    return %arg0, %c0_i32 : i32, i32
  }
}

</mosaic_0001>

<bundles_post_ra>
// kernel: neural_network_forward.1
= control target key start
LH: loop header
LB: loop body
LE: loop exit
PB: predicated region body
PF: predicated region fallthrough
CT: control target
= control target key end

     0   :  { %vm59_vm0 = vcmask 1043456   ;;  %vm55_vm1 = vcmask 424960   ;;  %vm112_vm2 = vcmask 261120   ;;  %vm142_vm3 = vcmask 64512   ;;  %s321_s1 = inlined_call_operand.vmem [shape: f32[180,32], index: 1, kind: input, shape index: {}]   ;;  %s322_s2 = inlined_call_operand.vmem [shape: f32[1,32], index: 2, kind: input, shape index: {}]   ;;  %s323_s0 = inlined_call_operand.vmem [shape: f32[8,180], index: 0, kind: input, shape index: {}]   ;;  %s324_s4 = inlined_call_operand.vmem [shape: f32[1,8], index: 4, kind: input, shape index: {}]   ;;  %s325_s3 = inlined_call_operand.vmem [shape: f32[32,8], index: 3, kind: input, shape index: {}]   ;;  %s326_s6 = inlined_call_operand.vmem [shape: f32[1,2], index: 6, kind: input, shape index: {}]   ;;  %s327_s5 = inlined_call_operand.vmem [shape: f32[8,2], index: 5, kind: input, shape index: {}]   ;;  %s328_s7 = inlined_call_operand.vmem [shape: f32[8,2], index: 7, kind: output, shape index: {}]  }
   0x1   :  { %v43_v0 = vld [vmem:[%s321_s1 + $0x78] sm:$0xff]  ;;  %v42_v1 = vld [vmem:[%s321_s1 + $0x70] sm:$0xff]  ;;  %v41_v2 = vld [vmem:[%s321_s1 + $0x68] sm:$0xff]  ;;  %vm166_vm4 = vcmask 15360  }
   0x2   :  { %63 = vmatpush.msra.mxu0 %v43_v0  ;;  %v50_v3 = vld [vmem:[%s321_s1 + $0xb0] sm:$0xf]  ;;  %v40_v4 = vld [vmem:[%s321_s1 + $0x60] sm:$0xff]  ;;  %v49_v5 = vld [vmem:[%s321_s1 + $0xa8] sm:$0xff] }
   0x3   :  { %172 = vmatpush.msk.msra.mxu1 %vm59_vm0, %v50_v3  ;;  %v48_v6 = vld [vmem:[%s321_s1 + $0xa0] sm:$0xff]  ;;  %v39_v7 = vld [vmem:[%s321_s1 + $0x58] sm:$0xff]  ;;  %v38_v9 = vld [vmem:[%s321_s1 + $0x50] sm:$0xff] }
   0x4   :  { %64 = vmatpush.msra.mxu0 %v42_v1  ;;  %v47_v8 = vld [vmem:[%s321_s1 + $0x98] sm:$0xff]  ;;  %v46_v10 = vld [vmem:[%s321_s1 + $0x90] sm:$0xff]  ;;  %v37_v11 = vld [vmem:[%s321_s1 + $0x48] sm:$0xff] }
   0x5   :  { %93 = vmatpush.msra.mxu1 %v49_v5  ;;  %v45_v12 = vld [vmem:[%s321_s1 + $0x88] sm:$0xff]  ;;  %v36_v13 = vld [vmem:[%s321_s1 + $0x40] sm:$0xff]  ;;  %v35_v15 = vld [vmem:[%s321_s1 + $0x38] sm:$0xff] }
   0x6   :  { %65 = vmatpush.msra.mxu0 %v41_v2  ;;  %v44_v14 = vld [vmem:[%s321_s1 + $0x80] sm:$0xff]  ;;  %v27_v16 = vld [vmem:[%s323_s0 + $0x8] sm:$0xff]  ;;  %v34_v17 = vld [vmem:[%s321_s1 + $0x30] sm:$0xff] }
   0x7   :  { %94 = vmatpush.msra.mxu1 %v48_v6  ;;  %v33_v18 = vld [vmem:[%s321_s1 + $0x28] sm:$0xff]  ;;  %v32_v19 = vld [vmem:[%s321_s1 + $0x20] sm:$0xff]  ;;  %v31_v20 = vld [vmem:[%s321_s1 + $0x18] sm:$0xff] }
   0x8   :  { %66 = vmatpush.msra.mxu0 %v40_v4  ;;  %v30_v21 = vld [vmem:[%s321_s1 + $0x10] sm:$0xff]  ;;  %v29_v22 = vld [vmem:[%s321_s1 + $0x8] sm:$0xff]  ;;  %v28_v23 = vld [vmem:[%s321_s1] sm:$0xff] }
   0x9   :  { %95 = vmatpush.msra.mxu1 %v47_v8  ;;  %v26_v24 = vld [vmem:[%s323_s0] sm:$0xff]  ;;  %v107_v25 = vld [vmem:[%s325_s3 + $0x18] sm:$0xff]  ;;  %v106_v26 = vld [vmem:[%s325_s3 + $0x10] sm:$0xff] }
   0xa   :  { %67 = vmatpush.msra.mxu0 %v39_v7  ;;  %128 = vmatpush.msra.mxu2 %v107_v25  ;;  %v105_v27 = vld [vmem:[%s325_s3 + $0x8] sm:$0xff]  ;;  %v104_v28 = vld [vmem:[%s325_s3] sm:$0xff] }
   0xb   :  { %96 = vmatpush.msra.mxu1 %v46_v10  ;;  %v176_v29 = vld [vmem:[%s322_s2] ss:$0 sm:$0xff] }
   0xc   :  { %68 = vmatpush.msra.mxu0 %v38_v9  ;;  %129 = vmatpush.msra.mxu2 %v106_v26  ;;  %v137_v35 = vld [vmem:[%s327_s5] sm:$0xff] }
   0xd   :  { %97 = vmatpush.msra.mxu1 %v45_v12  ;;  %161 = vmatpush.msra.mxu3 %v137_v35  ;;  %v177_v36 = vld [vmem:[%s324_s4] ss:$0 sm:$0xff] }
   0xe   :  { %69 = vmatpush.msra.mxu0 %v37_v11  ;;  %130 = vmatpush.msra.mxu2 %v105_v27  ;;  %v178_v40 = vld [vmem:[%s326_s6] ss:$0 sm:$0xff] }
   0xf   :  { %98 = vmatpush.msra.mxu1 %v44_v14 }
  0x10   :  { %70 = vmatpush.msra.mxu0 %v36_v13  ;;  %173 = vmatmul.msk.f32.vlgmr.msra.gmra.mxu1 %vm55_vm1, %v27_v16 }
  0x11   :  { %131 = vmatpush.msra.mxu2 %v104_v28 }
  0x12   :  { %71 = vmatpush.msra.mxu0 %v35_v15 }
  0x14   :  { %72 = vmatpush.msra.mxu0 %v34_v17 }
  0x16   :  { %73 = vmatpush.msra.mxu0 %v33_v18 }
  0x18   :  { %74 = vmatpush.msra.mxu0 %v32_v19 }
  0x1a   :  { %75 = vmatpush.msra.mxu0 %v31_v20 }
  0x1c   :  { %76 = vmatpush.msra.mxu0 %v30_v21 }
  0x1e   :  { %77 = vmatpush.msra.mxu0 %v29_v22 }
  0x20   :  { %78 = vmatpush.msra.mxu0 %v28_v23 }
  0x21   :  { %79 = vmatmul.f32.vlgmr.msra.gmra.mxu0 %v26_v24 }
  0x8d   :  { %v100_v31 = vpop.f32.mrf.mxu1 }
  0x9e   :  { %v80_v30 = vpop.f32.mrf.mxu0 }
  0x9f   :  { %v81_v32 = vadd.f32 %v176_v29, %v80_v30 }
  0xa1   :  { %v101_v33 = vadd.f32 %v100_v31, %v81_v32 }
  0xa3   :  { %v103_v34 = vmax.f32 %v101_v33, 0.0 }
  0xa5   :  { %174 = vmatmul.msk.f32.vlgmr.msra.gmra.mxu2 %vm112_vm2, %v103_v34 }
 0x128   :  { %v133_v37 = vpop.f32.mrf.mxu2 }
 0x129   :  { %v134_v38 = vadd.f32 %v177_v36, %v133_v37 }
 0x12b   :  { %v136_v39 = vmax.f32 %v134_v38, 0.0 }
 0x12d   :  { %175 = vmatmul.msk.f32.vlgmr.msra.gmra.mxu3 %vm142_vm3, %v136_v39 }
 0x1b0   :  { %v163_v41 = vpop.f32.mrf.mxu3 }
 0x1b1   :  { %v164_v42 = vadd.f32 %v178_v40, %v163_v41 }
 0x1b3   :  { %167 = vst.msk [vmem:[%s328_s7] sm:$0xff] %vm166_vm4, %v164_v42 }

</bundles_post_ra>
